<compile_context>
chip_gen: v6e
topology: v6e:2x2x1
jax: 0.10.0
libtpu: 0.0.40
codegen_flags: <defaults>
</compile_context>

<pallas_src>
import functools

import jax
import jax.numpy as jnp
from jax.experimental import pallas as pl
from jax.experimental.pallas import tpu as pltpu


def _conv_bn_relu_kernel(x_ref, w_ref, shift_ref, o_ref):
    # x_ref:     (Cin,  TS)   lane-dense spatial tile of one image (f32)
    # w_ref:     (Cout, Cin)  1x1 conv weight with BN scale folded in (bf16)
    # shift_ref: (Cout, 1)    folded BN shift = beta - mean * scale (f32)
    # o_ref:     (Cout, TS)   bf16 output tile
    x = x_ref[...].astype(jnp.bfloat16)          # cast on the VPU (plenty of slack)
    acc = jnp.dot(w_ref[...], x, preferred_element_type=jnp.float32)
    o_ref[...] = jnp.maximum(acc + shift_ref[...], 0.0).astype(o_ref.dtype)


def _round_up(v, m):
    return ((v + m - 1) // m) * m


@functools.partial(jax.jit, static_argnames=("padding", "max_tile_s", "out_dtype"))
def conv_bn_relu(x_nchw, weight, gamma, beta, run_mean, run_var,
                 *, padding=1, eps=1e-5, max_tile_s=2048,
                 out_dtype=jnp.bfloat16):
    """Forward of Conv: relu(bn(conv(x))) with k=1, s=1, p=padding, bias=False."""
    n, c_in, h, w = x_nchw.shape
    c_out = weight.shape[0]

    # --- glue (plain JAX, all cheap): NCHW is channel-major so this reshape is
    # a free bitcast; no input padding and no dtype convert pass.
    s = h * w
    x_flat = x_nchw.reshape(n, c_in, s)

    # Balanced lane-dense spatial tiles (multiples of 128), up to max_tile_s.
    s_rounded = _round_up(s, 128)
    n_tiles = max(1, -(-s_rounded // max_tile_s))          # ceil
    tile_s = _round_up(-(-s_rounded // n_tiles), 128)      # balanced, 128-aligned
    s_pad = n_tiles * tile_s
    if s_pad != s:
        x_flat = jnp.pad(x_flat, ((0, 0), (0, 0), (0, s_pad - s)))

    # Fold BN scale into the weights; keep a per-channel f32 shift for epilogue.
    scale = gamma / jnp.sqrt(run_var + eps)                               # (Cout,)
    w_mat = (weight.reshape(c_out, c_in) * scale[:, None]).astype(jnp.bfloat16)
    shift_f32 = (beta - run_mean * scale).astype(jnp.float32)             # (Cout,)
    shift = shift_f32.reshape(c_out, 1)

    grid = (n, n_tiles)

    # VMEM budget: double-buffered x/out tiles + resident weight/shift,
    # with 2x headroom; cap at v7x's 64 MiB physical VMEM.
    step_bytes = (2 * (c_in * tile_s * 4 + c_out * tile_s * 2)
                  + 2 * (c_out * c_in * 2 + c_out * 4))
    vmem_limit = int(min(64 * 1024 * 1024, max(16 * 1024 * 1024, 2 * step_bytes)))

    out_flat = pl.pallas_call(
        _conv_bn_relu_kernel,
        out_shape=jax.ShapeDtypeStruct((n, c_out, s_pad), jnp.bfloat16),
        grid_spec=pltpu.PrefetchScalarGridSpec(
            num_scalar_prefetch=0,
            grid=grid,
            in_specs=[
                pl.BlockSpec((None, c_in, tile_s), lambda b, j: (b, 0, j)),
                pl.BlockSpec((c_out, c_in), lambda b, j: (0, 0)),
                pl.BlockSpec((c_out, 1), lambda b, j: (0, 0)),
            ],
            out_specs=pl.BlockSpec((None, c_out, tile_s), lambda b, j: (b, 0, j)),
        ),
        compiler_params=pltpu.CompilerParams(
            dimension_semantics=("parallel", "parallel"),
            vmem_limit_bytes=vmem_limit),
        cost_estimate=pl.CostEstimate(
            flops=2 * n * s_pad * c_in * c_out,
            transcendentals=0,
            bytes_accessed=(n * s_pad * (c_in * 4 + c_out * 2)
                            + c_out * c_in * 2 + c_out * 4)),
    )(x_flat, w_mat, shift)

    # --- glue: drop lane padding (no-op at the test shape) and compose the
    # padded border ring, which for k=1 is analytically relu(shift_c).
    interior = out_flat[:, :, :s] if s_pad != s else out_flat
    interior = interior.reshape(n, c_out, h, w).astype(out_dtype)
    if padding == 0:
        return interior

    hp, wp = h + 2 * padding, w + 2 * padding
    border = jnp.maximum(shift_f32, 0.0).astype(out_dtype)                # (Cout,)
    base = jnp.broadcast_to(border.reshape(1, c_out, 1, 1), (n, c_out, hp, wp))
    return base.at[:, :, padding:padding + h, padding:padding + w].set(interior)


def _reference(x_nchw, weight, gamma, beta, run_mean, run_var, padding=1, eps=1e-5):
    """Pure-JAX reference of the same forward (for correctness check)."""
    y = jax.lax.conv_general_dilated(
        x_nchw.astype(jnp.float32), weight.astype(jnp.float32),
        window_strides=(1, 1), padding=[(padding, padding), (padding, padding)],
        dimension_numbers=("NCHW", "OIHW", "NCHW"))
    scale = gamma / jnp.sqrt(run_var + eps)
    shift = beta - run_mean * scale
    y = y * scale[None, :, None, None] + shift[None, :, None, None]
    return jnp.maximum(y, 0.0)


if __name__ == "__main__":
    # Shapes consistent with Conv(c1=4, c2=8, k=1, s=1, p=1)
    N, C1, C2, H, W = 2, 4, 8, 16, 16

    key = jax.random.PRNGKey(0)
    k_x, k_w, k_g, k_b, k_m, k_v = jax.random.split(key, 6)

    x = jax.random.normal(k_x, (N, C1, H, W), dtype=jnp.float32)
    weight = jax.random.normal(k_w, (C2, C1, 1, 1), dtype=jnp.float32) * 0.1
    gamma = 1.0 + 0.1 * jax.random.normal(k_g, (C2,), dtype=jnp.float32)
    beta = 0.1 * jax.random.normal(k_b, (C2,), dtype=jnp.float32)
    run_mean = 0.05 * jax.random.normal(k_m, (C2,), dtype=jnp.float32)
    run_var = 1.0 + 0.1 * jax.random.uniform(k_v, (C2,), dtype=jnp.float32)

    out = conv_bn_relu(x, weight, gamma, beta, run_mean, run_var, padding=1)
    out = jax.block_until_ready(out)

    ref = _reference(x, weight, gamma, beta, run_mean, run_var, padding=1)
    assert out.shape == (N, C2, H + 2, W + 2), out.shape
    # bf16 MXU operands + bf16 output store (f32 accumulation) => loose tolerance.
    max_err = float(jnp.max(jnp.abs(out.astype(jnp.float32) - ref)))
    assert max_err < 2e-2, max_err

    print("KERNEL_OK")
</pallas_src>

<mosaic_0001>
module attributes {stable_mosaic.version = 11 : i64} {
  func.func @_conv_bn_relu_kernel(%arg0: i32, %arg1: i32, %arg2: memref<1x4x256xf32, #tpu.memory_space<vmem>>, %arg3: memref<8x4xbf16, #tpu.memory_space<vmem>>, %arg4: memref<8x1xf32, #tpu.memory_space<vmem>>, %arg5: memref<1x8x256xbf16, #tpu.memory_space<vmem>>) attributes {dimension_semantics = [#tpu.dimension_semantics<parallel>, #tpu.dimension_semantics<parallel>], iteration_bounds = array<i64: 2, 1>, scalar_prefetch = 0 : i64, scratch_operands = 0 : i64, tpu.core_type = #tpu.core_type<tc>, window_params = [{transform_indices = @transform_0, window_bounds = array<i64: 1, 4, 256>}, {pipeline_mode = #tpu.pipeline_mode<synchronous>, transform_indices = @transform_1, window_bounds = array<i64: 8, 4>}, {pipeline_mode = #tpu.pipeline_mode<synchronous>, transform_indices = @transform_2, window_bounds = array<i64: 8, 1>}, {transform_indices = @transform_3, window_bounds = array<i64: 1, 8, 256>}]} {
    %c0 = arith.constant 0 : index
    %c0_0 = arith.constant 0 : index
    %c0_1 = arith.constant 0 : index
    %0 = vector.load %arg2[%c0, %c0_0, %c0_1] : memref<1x4x256xf32, #tpu.memory_space<vmem>>, vector<1x4x256xf32>
    %1 = vector.shape_cast %0 : vector<1x4x256xf32> to vector<4x256xf32>
    %2 = arith.truncf %1 : vector<4x256xf32> to vector<4x256xbf16>
    %c0_2 = arith.constant 0 : index
    %c0_3 = arith.constant 0 : index
    %3 = vector.load %arg3[%c0_2, %c0_3] : memref<8x4xbf16, #tpu.memory_space<vmem>>, vector<8x4xbf16>
    %cst = arith.constant dense<0.000000e+00> : vector<8x256xf32>
    %4 = tpu.matmul %3, %2, %cst {dimension_numbers = #tpu.dot_dimension_numbers<[1], [0], [0], [1], [0, 0, 1, 1], [], []>} : vector<8x4xbf16>, vector<4x256xbf16>, vector<8x256xf32> -> vector<8x256xf32>
    %c0_4 = arith.constant 0 : index
    %c0_5 = arith.constant 0 : index
    %5 = vector.load %arg4[%c0_4, %c0_5] : memref<8x1xf32, #tpu.memory_space<vmem>>, vector<8x1xf32>
    %6 = vector.broadcast %5 : vector<8x1xf32> to vector<8x256xf32>
    %7 = arith.addf %4, %6 : vector<8x256xf32>
    %cst_6 = arith.constant 0.000000e+00 : f32
    %8 = vector.broadcast %cst_6 : f32 to vector<8x256xf32>
    %9 = arith.maximumf %7, %8 : vector<8x256xf32>
    %10 = arith.truncf %9 : vector<8x256xf32> to vector<8x256xbf16>
    %c0_7 = arith.constant 0 : index
    %c0_8 = arith.constant 0 : index
    %c0_9 = arith.constant 0 : index
    %11 = vector.load %arg5[%c0_7, %c0_8, %c0_9] : memref<1x8x256xbf16, #tpu.memory_space<vmem>>, vector<1x8x256xbf16>
    %12 = vector.shape_cast %11 : vector<1x8x256xbf16> to vector<8x256xbf16>
    %13 = vector.shape_cast %10 : vector<8x256xbf16> to vector<1x8x256xbf16>
    tpu.vector_store %arg5[%c0_7, %c0_8, %c0_9], %13 {strides = array<i32>} : memref<1x8x256xbf16, #tpu.memory_space<vmem>>, vector<1x8x256xbf16>,
    return
  }
  func.func @transform_0(%arg0: i32, %arg1: i32) -> (i32, i32, i32) {
    %c0_i32 = arith.constant 0 : i32
    %c0_i32_0 = arith.constant 0 : i32
    return %arg0, %c0_i32, %arg1 : i32, i32, i32
  }
  func.func @transform_1(%arg0: i32, %arg1: i32) -> (i32, i32) {
    %c0_i32 = arith.constant 0 : i32
    %c0_i32_0 = arith.constant 0 : i32
    %c0_i32_1 = arith.constant 0 : i32
    return %c0_i32, %c0_i32_0 : i32, i32
  }
  func.func @transform_2(%arg0: i32, %arg1: i32) -> (i32, i32) {
    %c0_i32 = arith.constant 0 : i32
    %c0_i32_0 = arith.constant 0 : i32
    %c0_i32_1 = arith.constant 0 : i32
    return %c0_i32, %c0_i32_0 : i32, i32
  }
  func.func @transform_3(%arg0: i32, %arg1: i32) -> (i32, i32, i32) {
    %c0_i32 = arith.constant 0 : i32
    %c0_i32_0 = arith.constant 0 : i32
    return %arg0, %c0_i32, %arg1 : i32, i32, i32
  }
}

</mosaic_0001>

<bundles_post_ra>
// kernel: conv_bn_relu.1
= control target key start
LH: loop header
LB: loop body
LE: loop exit
PB: predicated region body
PF: predicated region fallthrough
CT: control target
= control target key end

     0   :  { %s463_s12 = smov 0   ;;  %s465_s13 = smov 0   ;;  %s502_s0 = inlined_call_operand.vmem [shape: f32[2,4,256], index: 0, kind: input, shape index: {}]   ;;  %s503_s1 = inlined_call_operand.vmem [shape: bf16[8,4], index: 1, kind: input, shape index: {}]   ;;  %s504_s2 = inlined_call_operand.vmem [shape: f32[8,1], index: 2, kind: input, shape index: {}]   ;;  %s505_s3 = inlined_call_operand.vmem [shape: bf16[2,8,256], index: 3, kind: output, shape index: {}]  }
   0x1   :  { %s467_s14 = smov 0  }
   0x2 LB: > { %s25_s15 = sadd.s32 1, %s436_s13  ;;  %p378_p0 = scmp.ge.s32.totalorder %s440_s14, 1  ;;  %s440_s14 = sphi %s467_s14, %s13_s14   ;;  %s436_s13 = sphi %s465_s13, %s507_s13   ;;  %s432_s12 = sphi %s463_s12, %s506_s12  }
   0x3   : > { %p27_p1 = scmp.ge.s32.totalorder %s25_s15, 2  ;;  %p158_p2 = scmp.lt.s32.totalorder %s440_s14, 3 }
   0x5   : > { %s509_s15 = smov (%p27_p1, %s25_s15), 0  ;;  %p159_p3 = pnand %p378_p0, %p158_p2 }
   0x6   : > { %p191_p4 = scmp.lt.s32.totalorder (!%p159_p3), %s432_s12, 1 }
   0x7   : > { %162 = sbr.rel (%p159_p3) target bundleno = 226 (0xe2), region = 32 }
   0xc   : > { %v442_v0 = vmov 0   ;;  %v218_v1 = vld [vmem:[%s504_s2] sm:$0xff]  ;;  %s511_s12 = smov (!%p191_p4, %s432_s12), 1  ;;  %vm228_vm0 = vcmask 1041408   ;;  %vm224_vm1 = vcmask 31744  }
   0xd   : > { %267 = vmatprep.mubr.bf16.mxu0 %v442_v0  ;;  %416 = vset.pattern.permute.xlu0 %v442_v0  ;;  %s388_s18 = sshll.u32 %s511_s12, 3  ;;  %v217_v7 = vld [vmem:[%s503_s1] sm:$0xf] }
   0xe   : > { %221 = vperm.xlu0 %416, %v218_v1   ;;  %s198_s21 = scalar_lea.vmem %s502_s0, %s388_s18  ;;  %s208_s26 = scalar_lea.vmem %s505_s3, %s388_s18 }
   0xf   : > { %v211_v2 = vld [vmem:[%s198_s21] sm:$0xff] }
  0x10   : > { %v213_v3 = vcombine.high %v211_v2, %v211_v2  ;;  %v215_v4 = vpack.c.bf16 %v211_v2, %v211_v2 }
  0x12   : > { %v216_v5 = vpack.c.bf16 %v213_v3, %v213_v3  ;;  %v230_v6 = vsel %vm228_vm0, %v215_v4, 0 }
  0x14   : > { %383 = vmatprep.subr.msk.bf16.mxu0 %vm228_vm0, %v216_v5 }
  0x15   : > { %250 = vmatpush1.bf16.msra.mxu0 %v230_v6 }
  0x18   : > { %384 = vmatmul.mubr.msk.bf16.vlgmr.msra.gmra.mxu0 %vm224_vm1, %v217_v7 }
  0x89   : > { %v222_v8 = vpop.permute.xlu0 %221 }
  0xd8   : > { %v269_v9 = vpop.f32.mrf.mxu0 }
  0xd9   : > { %v270_v10 = vadd.f32 %v269_v9, %v222_v8 }
  0xda   : > { %v271_v11 = vpop.f32.mrf.mxu0 }
  0xdb   : > { %v272_v12 = vadd.f32 %v271_v11, %v222_v8  ;;  %v276_v14 = vmax.f32 %v270_v10, 0.0 }
  0xdc   : > { %v273_v13 = vpop.f32.mrf.mxu0 }
  0xdd   : > { %v277_v15 = vmax.f32 %v272_v12, 0.0 }
  0xde   : > { %v274_v16 = vpop.f32.mrf.mxu0 }
  0xdf   : > { %v390_v17 = vpack.c.bf16 %v277_v15, %v276_v14 }
  0xe1   : > { %286 = vst [vmem:[%s208_s26] sm:$0xff] %v390_v17 }
  0xe2 PF: > { %s13_s14 = sadd.s32 1, %s440_s14   ;;  %s506_s12 = smov %s436_s13 }
  0xe3   : > { %p10_p5 = scmp.ge.s32.totalorder %s13_s14, 4   ;;  %s507_s13 = smov %s509_s15 }
  0xe5   :  { %12 = sbr.rel (!%p10_p5) target bundleno = 2 (0x2), region = 62 }

</bundles_post_ra>
